<compile_context>
chip_gen: v6e
topology: v6e:2x2x1
jax: 0.10.0
libtpu: 0.0.40
codegen_flags: <defaults>
</compile_context>

<pallas_src>
import math

import jax
import jax.numpy as jnp
from jax import lax
from jax.experimental import pallas as pl
from jax.experimental.pallas import tpu as pltpu

# ----------------------------- config ---------------------------------------
NUM_CLASSES = 3
POOLED = 7
SAMPLING = 2
REPRESENTATION = 32
BBOX_REG_W = (10.0, 10.0, 5.0, 5.0)
BBOX_XFORM_CLIP = math.log(1000.0 / 16.0)
LANE = 128


def _round_up(x, m):
    return ((x + m - 1) // m) * m


# ======================= kernel 1: separable RoIAlign ========================
def _roi_align_kernel(idx_ref, ay_ref, ax_ref, feat_ref, out_ref):
    # One box per grid step.
    #   out[c, py, px] = sum_h ay[py, h] * (sum_w feat[c, h, w] * ax[px, w])
    del idx_ref  # consumed by the index_maps (selects this box's image block)
    feat = feat_ref[0]                                   # (C, H, W)  bf16
    c = feat.shape[0]
    ax_b = jnp.broadcast_to(ax_ref[...], (c,) + ax_ref.shape[1:])  # (C, P, W)
    ay_b = jnp.broadcast_to(ay_ref[...], (c,) + ay_ref.shape[1:])  # (C, P, H)

    # stage 1: contract W  -> (C, H, Px)     (batched A @ B^T, f32 accumulation)
    s = lax.dot_general(feat, ax_b,
                        dimension_numbers=(((2,), (2,)), ((0,), (0,))),
                        preferred_element_type=jnp.float32)
    # stage 2: contract H  -> (C, Py, Px)
    out = lax.dot_general(ay_b, s.astype(jnp.bfloat16),
                          dimension_numbers=(((2,), (1,)), ((0,), (0,))),
                          preferred_element_type=jnp.float32)
    out_ref[0] = out                                     # (C, P, P)  f32


def roi_align(features_bf16, ay, ax, img_idx):
    N, C, H, W = features_bf16.shape
    R = ay.shape[0]
    P = POOLED
    grid_spec = pltpu.PrefetchScalarGridSpec(
        num_scalar_prefetch=1,
        grid=(R,),
        in_specs=[
            pl.BlockSpec((1, P, H), lambda r, idx: (r, 0, 0)),
            pl.BlockSpec((1, P, W), lambda r, idx: (r, 0, 0)),
            pl.BlockSpec((1, C, H, W), lambda r, idx: (idx[r], 0, 0, 0)),
        ],
        out_specs=pl.BlockSpec((1, C, P, P), lambda r, idx: (r, 0, 0, 0)),
    )
    return pl.pallas_call(
        _roi_align_kernel,
        out_shape=jax.ShapeDtypeStruct((R, C, P, P), jnp.float32),
        grid_spec=grid_spec,
        compiler_params=pltpu.CompilerParams(
            dimension_semantics=("parallel",),
            vmem_limit_bytes=32 * 1024 * 1024),
    )(img_idx, ay, ax, features_bf16)


# ============ kernel 2: fused box_head + predictors + postprocess ============
def _head_postprocess_kernel(x_ref, meta_ref, w6_ref, b6_ref, w7_ref, b7_ref,
                             wh_ref, bh_ref, out_ref):
    nc = NUM_CLASSES
    rwx, rwy, rww, rwh = BBOX_REG_W

    # TwoMLPHead (bf16 MXU matmuls, f32 accumulation, 128-lane padded)
    h = jnp.dot(x_ref[...], w6_ref[...], preferred_element_type=jnp.float32) + b6_ref[...]
    h = jnp.maximum(h, 0.0).astype(jnp.bfloat16)
    h = jnp.dot(h, w7_ref[...], preferred_element_type=jnp.float32) + b7_ref[...]
    h = jnp.maximum(h, 0.0).astype(jnp.bfloat16)
    # fused predictor heads: columns = [cls | dx | dy | dw | dh | angle | 0-pad]
    z = jnp.dot(h, wh_ref[...], preferred_element_type=jnp.float32) + bh_ref[...]

    logits = z[:, 0:nc]
    dx = z[:, nc:2 * nc]
    dy = z[:, 2 * nc:3 * nc]
    dw = z[:, 3 * nc:4 * nc]
    dh = z[:, 4 * nc:5 * nc]
    ang = z[:, 5 * nc:5 * nc + 1]

    # softmax over classes (f32 on the VPU/EUP)
    m = jnp.max(logits, axis=-1, keepdims=True)
    e = jnp.exp(logits - m)
    scores = e / jnp.sum(e, axis=-1, keepdims=True)

    # box_coder.decode + clip_boxes_to_image
    meta = meta_ref[...]                         # [x1, y1, x2, y2, imgW, imgH, 0, 0]
    px1 = meta[:, 0:1]
    py1 = meta[:, 1:2]
    px2 = meta[:, 2:3]
    py2 = meta[:, 3:4]
    iw = meta[:, 4:5]
    ih = meta[:, 5:6]
    pw = px2 - px1
    ph = py2 - py1
    pcx = px1 + 0.5 * pw
    pcy = py1 + 0.5 * ph

    tdx = dx / rwx
    tdy = dy / rwy
    tdw = jnp.minimum(dw / rww, BBOX_XFORM_CLIP)
    tdh = jnp.minimum(dh / rwh, BBOX_XFORM_CLIP)
    cx = tdx * pw + pcx
    cy = tdy * ph + pcy
    bw = jnp.exp(tdw) * pw
    bhh = jnp.exp(tdh) * ph

    x1 = jnp.minimum(jnp.maximum(cx - 0.5 * bw, 0.0), iw)
    y1 = jnp.minimum(jnp.maximum(cy - 0.5 * bhh, 0.0), ih)
    x2 = jnp.minimum(jnp.maximum(cx + 0.5 * bw, 0.0), iw)
    y2 = jnp.minimum(jnp.maximum(cy + 0.5 * bhh, 0.0), ih)

    used = 5 * nc + 1
    pad = jnp.zeros((z.shape[0], z.shape[1] - used), jnp.float32)
    # single lane-dense (rows, 128) store
    out_ref[...] = jnp.concatenate([scores, x1, y1, x2, y2, ang, pad], axis=-1)


def fused_head_postprocess(x_pad, meta, packed, tr):
    r_pad, f_pad = x_pad.shape
    return pl.pallas_call(
        _head_postprocess_kernel,
        out_shape=jax.ShapeDtypeStruct((r_pad, LANE), jnp.float32),
        grid=(r_pad // tr,),
        in_specs=[
            pl.BlockSpec((tr, f_pad), lambda i: (i, 0)),
            pl.BlockSpec((tr, 8), lambda i: (i, 0)),
            # weights: constant index_map -> VMEM-resident across row blocks
            pl.BlockSpec(packed["w6"].shape, lambda i: (0, 0)),
            pl.BlockSpec(packed["b6"].shape, lambda i: (0, 0)),
            pl.BlockSpec(packed["w7"].shape, lambda i: (0, 0)),
            pl.BlockSpec(packed["b7"].shape, lambda i: (0, 0)),
            pl.BlockSpec(packed["wh"].shape, lambda i: (0, 0)),
            pl.BlockSpec(packed["bh"].shape, lambda i: (0, 0)),
        ],
        out_specs=pl.BlockSpec((tr, LANE), lambda i: (i, 0)),
        compiler_params=pltpu.CompilerParams(
            dimension_semantics=("parallel",),
            vmem_limit_bytes=32 * 1024 * 1024),
    )(x_pad, meta, packed["w6"], packed["b6"], packed["w7"], packed["b7"],
      packed["wh"], packed["bh"])


# --------------- RoIAlign interpolation factors (small, plain JAX) ----------
def _axis_weights(coords, size):
    # bilinear weights of each sample coordinate onto the `size` grid rows/cols,
    # matching torchvision roi_align (aligned=False) border handling.
    valid = (coords >= -1.0) & (coords <= size)
    c = jnp.maximum(coords, 0.0)
    low = jnp.floor(c)
    at_border = low >= (size - 1)
    low = jnp.minimum(low, size - 1.0)
    high = jnp.minimum(low + 1.0, size - 1.0)
    c = jnp.where(at_border, low, c)
    l = c - low
    h = 1.0 - l
    grid = jnp.arange(size, dtype=jnp.float32)
    w = (h[..., None] * (grid == low[..., None]).astype(jnp.float32)
         + l[..., None] * (grid == high[..., None]).astype(jnp.float32))
    return w * valid[..., None].astype(jnp.float32)


def build_roi_interp_factors(boxes, H, W, spatial_scale):
    x1 = boxes[:, 0] * spatial_scale
    y1 = boxes[:, 1] * spatial_scale
    x2 = boxes[:, 2] * spatial_scale
    y2 = boxes[:, 3] * spatial_scale
    roi_w = jnp.maximum(x2 - x1, 1.0)
    roi_h = jnp.maximum(y2 - y1, 1.0)
    bin_w = roi_w / POOLED
    bin_h = roi_h / POOLED
    p = jnp.arange(POOLED, dtype=jnp.float32)
    s = jnp.arange(SAMPLING, dtype=jnp.float32)
    ys = (y1[:, None, None] + p[None, :, None] * bin_h[:, None, None]
          + (s[None, None, :] + 0.5) * bin_h[:, None, None] / SAMPLING)
    xs = (x1[:, None, None] + p[None, :, None] * bin_w[:, None, None]
          + (s[None, None, :] + 0.5) * bin_w[:, None, None] / SAMPLING)
    ay = _axis_weights(ys, H).mean(axis=2)   # [R, P, H]
    ax = _axis_weights(xs, W).mean(axis=2)   # [R, P, W]
    return ay, ax


# ----------------------------- params ---------------------------------------
def init_params(key, in_features, rep, num_classes):
    ks = jax.random.split(key, 5)

    def lin(k, fan_in, fan_out):
        w = jax.random.normal(k, (fan_in, fan_out), jnp.float32) * 0.02
        b = jnp.zeros((1, fan_out), jnp.float32)
        return w, b

    w6, b6 = lin(ks[0], in_features, rep)
    w7, b7 = lin(ks[1], rep, rep)
    wcls, bcls = lin(ks[2], rep, num_classes)
    wbox, bbox = lin(ks[3], rep, num_classes * 4)
    wang, bang = lin(ks[4], rep, 1)          # prediction_method == 'regression'
    return dict(w6=w6, b6=b6, w7=w7, b7=b7, wcls=wcls, bcls=bcls,
                wbox=wbox, bbox=bbox, wang=wang, bang=bang)


def pack_params(params, f_pad, rep_pad=LANE, out_pad=LANE):
    """Zero-pad FC dims to 128 lanes and fuse the three predictor heads into a
    single lane-dense weight, reordering the box-delta columns component-major
    ([dx_c*, dy_c*, dw_c*, dh_c*]) so the kernel slices contiguous lanes."""
    F, rep = params["w6"].shape
    nc = params["wcls"].shape[1]

    w6 = jnp.zeros((f_pad, rep_pad), jnp.float32).at[:F, :rep].set(params["w6"])
    b6 = jnp.zeros((1, rep_pad), jnp.float32).at[:, :rep].set(params["b6"])
    w7 = jnp.zeros((rep_pad, rep_pad), jnp.float32).at[:rep, :rep].set(params["w7"])
    b7 = jnp.zeros((1, rep_pad), jnp.float32).at[:, :rep].set(params["b7"])

    wbox = params["wbox"].reshape(rep, nc, 4).transpose(0, 2, 1).reshape(rep, 4 * nc)
    bbox = params["bbox"].reshape(1, nc, 4).transpose(0, 2, 1).reshape(1, 4 * nc)
    w_heads = jnp.concatenate([params["wcls"], wbox, params["wang"]], axis=1)
    b_heads = jnp.concatenate([params["bcls"], bbox, params["bang"]], axis=1)
    used = w_heads.shape[1]
    wh = jnp.zeros((rep_pad, out_pad), jnp.float32).at[:rep, :used].set(w_heads)
    bh = jnp.zeros((1, out_pad), jnp.float32).at[:, :used].set(b_heads)

    return dict(w6=w6.astype(jnp.bfloat16), b6=b6,
                w7=w7.astype(jnp.bfloat16), b7=b7,
                wh=wh.astype(jnp.bfloat16), bh=bh)


# ----------------------------- forward --------------------------------------
def roi_heads_forward(features, proposals_list, image_shapes, params, spatial_scale):
    """Inference-mode RoIHeads.forward (training branch not exercised)."""
    N, C, H, W = features.shape
    r_per = [int(p.shape[0]) for p in proposals_list]
    boxes = jnp.concatenate(proposals_list, axis=0)                       # [R, 4]
    img_idx = jnp.concatenate([jnp.full((r,), i, jnp.int32)
                               for i, r in enumerate(r_per)])
    R = boxes.shape[0]

    # ---- box_roi_pool (separable RoIAlign, per-box grid, scalar prefetch) ----
    ay, ax = build_roi_interp_factors(boxes, H, W, spatial_scale)
    pooled = roi_align(features.astype(jnp.bfloat16),
                       ay.astype(jnp.bfloat16), ax.astype(jnp.bfloat16),
                       img_idx)                                           # [R, C, P, P] f32

    # ---- box_head + predictors + postprocess (single fused Pallas kernel) ----
    F = C * POOLED * POOLED
    f_pad = _round_up(F, LANE)
    tr = min(LANE, _round_up(R, 8))
    r_pad = _round_up(R, tr)

    x = pooled.reshape(R, F).astype(jnp.bfloat16)                         # torch (C,P,P) layout
    x_pad = jnp.zeros((r_pad, f_pad), jnp.bfloat16).at[:R, :F].set(x)

    wh_per_img = jnp.asarray([[float(s[1]), float(s[0])] for s in image_shapes],
                             dtype=jnp.float32)
    img_wh = wh_per_img[img_idx]                                          # [R, 2]
    meta = (jnp.zeros((r_pad, 8), jnp.float32)
            .at[:R, 0:4].set(boxes)
            .at[:R, 4:6].set(img_wh))

    packed = pack_params(params, f_pad)
    fused = fused_head_postprocess(x_pad, meta, packed, tr)[:R]           # [R, 128]

    nc = NUM_CLASSES
    scores = fused[:, 0:nc]
    x1 = fused[:, nc:2 * nc]
    y1 = fused[:, 2 * nc:3 * nc]
    x2 = fused[:, 3 * nc:4 * nc]
    y2 = fused[:, 4 * nc:5 * nc]
    angles = fused[:, 5 * nc:5 * nc + 1]
    pred_boxes = jnp.stack([x1, y1, x2, y2], axis=-1)                     # [R, nc, 4]

    # per-image assembly; drop background class (column 0)
    result = []
    start = 0
    for i, r in enumerate(r_per):
        b = pred_boxes[start:start + r, 1:, :].reshape(-1, 4)
        sc = scores[start:start + r, 1:].reshape(-1)
        lb = jnp.tile(jnp.arange(1, nc, dtype=jnp.int32), (r,))
        ang = angles[start:start + r, 0]
        # TODO(synk): score_thresh filtering, batched_nms and per-image top-k keep
        # have data-dependent output shapes; left outside the fixed-shape path.
        result.append({"boxes": b, "scores": sc, "labels": lb, "angles": ang})
        start += r
    losses = {}  # eval mode: fastrcnn_loss / proposal-sampling branch not exercised
    return result, losses


# ------------------------------ main -----------------------------------------
if __name__ == "__main__":
    key = jax.random.PRNGKey(0)
    kf, kp1, kp2, kw = jax.random.split(key, 4)

    N, C, H, W = 2, 4, 16, 16
    img_h, img_w = 32, 32
    features = jax.random.normal(kf, (N, C, H, W), jnp.float32)

    def make_boxes(k, n):
        k1, k2 = jax.random.split(k)
        xy1 = jax.random.uniform(k1, (n, 2), minval=0.0, maxval=20.0)
        wh = jax.random.uniform(k2, (n, 2), minval=2.0, maxval=10.0)
        return jnp.concatenate([xy1, xy1 + wh], axis=1).astype(jnp.float32)

    proposals = [make_boxes(kp1, 8), make_boxes(kp2, 8)]
    image_shapes = [(img_h, img_w), (img_h, img_w)]
    spatial_scale = H / img_h  # 0.5

    params = init_params(kw, C * POOLED * POOLED, REPRESENTATION, NUM_CLASSES)

    result, losses = roi_heads_forward(features, proposals, image_shapes,
                                       params, spatial_scale)
    jax.block_until_ready(result)
    print("KERNEL_OK")
</pallas_src>

<mosaic_0001>
module attributes {stable_mosaic.version = 11 : i64} {
  func.func @_roi_align_kernel(%arg0: i32, %arg1: memref<16xi32, #tpu.memory_space<smem>>, %arg2: memref<1x7x16xbf16, #tpu.memory_space<vmem>>, %arg3: memref<1x7x16xbf16, #tpu.memory_space<vmem>>, %arg4: memref<1x4x16x16xbf16, #tpu.memory_space<vmem>>, %arg5: memref<1x4x7x7xf32, #tpu.memory_space<vmem>>) attributes {dimension_semantics = [#tpu.dimension_semantics<parallel>], iteration_bounds = array<i64: 16>, scalar_prefetch = 1 : i64, scratch_operands = 0 : i64, tpu.core_type = #tpu.core_type<tc>, window_params = [{transform_indices = @transform_0, window_bounds = array<i64: 1, 7, 16>}, {transform_indices = @transform_1, window_bounds = array<i64: 1, 7, 16>}, {transform_indices = @transform_2, window_bounds = array<i64: 1, 4, 16, 16>}, {transform_indices = @transform_3, window_bounds = array<i64: 1, 4, 7, 7>}]} {
    %c0 = arith.constant 0 : index
    %c0_0 = arith.constant 0 : index
    %c0_1 = arith.constant 0 : index
    %c0_2 = arith.constant 0 : index
    %0 = vector.load %arg4[%c0, %c0_0, %c0_1, %c0_2] : memref<1x4x16x16xbf16, #tpu.memory_space<vmem>>, vector<1x4x16x16xbf16>
    %1 = vector.shape_cast %0 : vector<1x4x16x16xbf16> to vector<4x16x16xbf16>
    %c0_3 = arith.constant 0 : index
    %c0_4 = arith.constant 0 : index
    %c0_5 = arith.constant 0 : index
    %2 = vector.load %arg3[%c0_3, %c0_4, %c0_5] : memref<1x7x16xbf16, #tpu.memory_space<vmem>>, vector<1x7x16xbf16>
    %3 = vector.shape_cast %2 : vector<1x7x16xbf16> to vector<1x7x16xbf16>
    %4 = vector.broadcast %3 : vector<1x7x16xbf16> to vector<4x7x16xbf16>
    %c0_6 = arith.constant 0 : index
    %c0_7 = arith.constant 0 : index
    %c0_8 = arith.constant 0 : index
    %5 = vector.load %arg2[%c0_6, %c0_7, %c0_8] : memref<1x7x16xbf16, #tpu.memory_space<vmem>>, vector<1x7x16xbf16>
    %6 = vector.shape_cast %5 : vector<1x7x16xbf16> to vector<1x7x16xbf16>
    %7 = vector.broadcast %6 : vector<1x7x16xbf16> to vector<4x7x16xbf16>
    %cst = arith.constant dense<0.000000e+00> : vector<4x16x7xf32>
    %8 = tpu.matmul %1, %4, %cst {dimension_numbers = #tpu.dot_dimension_numbers<[2], [2], [1], [1], [0, 0, 0, 1, 1, 1], [0], [0]>} : vector<4x16x16xbf16>, vector<4x7x16xbf16>, vector<4x16x7xf32> -> vector<4x16x7xf32>
    %9 = arith.truncf %8 : vector<4x16x7xf32> to vector<4x16x7xbf16>
    %cst_9 = arith.constant dense<0.000000e+00> : vector<4x7x7xf32>
    %10 = tpu.matmul %7, %9, %cst_9 {dimension_numbers = #tpu.dot_dimension_numbers<[2], [1], [1], [2], [0, 0, 0, 1, 1, 2], [0], [0]>} : vector<4x7x16xbf16>, vector<4x16x7xbf16>, vector<4x7x7xf32> -> vector<4x7x7xf32>
    %c0_10 = arith.constant 0 : index
    %c0_11 = arith.constant 0 : index
    %c0_12 = arith.constant 0 : index
    %c0_13 = arith.constant 0 : index
    %11 = vector.load %arg5[%c0_10, %c0_11, %c0_12, %c0_13] : memref<1x4x7x7xf32, #tpu.memory_space<vmem>>, vector<1x4x7x7xf32>
    %12 = vector.shape_cast %11 : vector<1x4x7x7xf32> to vector<4x7x7xf32>
    %13 = vector.shape_cast %10 : vector<4x7x7xf32> to vector<1x4x7x7xf32>
    tpu.vector_store %arg5[%c0_10, %c0_11, %c0_12, %c0_13], %13 {strides = array<i32>} : memref<1x4x7x7xf32, #tpu.memory_space<vmem>>, vector<1x4x7x7xf32>,
    return
  }
  func.func @transform_0(%arg0: i32, %arg1: memref<16xi32, #tpu.memory_space<smem>>) -> (i32, i32, i32) {
    %c0_i32 = arith.constant 0 : i32
    %c0_i32_0 = arith.constant 0 : i32
    %c0_i32_1 = arith.constant 0 : i32
    return %arg0, %c0_i32, %c0_i32_0 : i32, i32, i32
  }
  func.func @transform_1(%arg0: i32, %arg1: memref<16xi32, #tpu.memory_space<smem>>) -> (i32, i32, i32) {
    %c0_i32 = arith.constant 0 : i32
    %c0_i32_0 = arith.constant 0 : i32
    %c0_i32_1 = arith.constant 0 : i32
    return %arg0, %c0_i32, %c0_i32_0 : i32, i32, i32
  }
  func.func @transform_2(%arg0: i32, %arg1: memref<16xi32, #tpu.memory_space<smem>>) -> (i32, i32, i32, i32) {
    %0 = arith.index_cast %arg0 : i32 to index
    %1 = memref.load %arg1[%0] : memref<16xi32, #tpu.memory_space<smem>>
    %c0_i32 = arith.constant 0 : i32
    %c0_i32_0 = arith.constant 0 : i32
    %c0_i32_1 = arith.constant 0 : i32
    %c0_i32_2 = arith.constant 0 : i32
    return %1, %c0_i32, %c0_i32_0, %c0_i32_1 : i32, i32, i32, i32
  }
  func.func @transform_3(%arg0: i32, %arg1: memref<16xi32, #tpu.memory_space<smem>>) -> (i32, i32, i32, i32) {
    %c0_i32 = arith.constant 0 : i32
    %c0_i32_0 = arith.constant 0 : i32
    %c0_i32_1 = arith.constant 0 : i32
    %c0_i32_2 = arith.constant 0 : i32
    return %arg0, %c0_i32, %c0_i32_0, %c0_i32_1 : i32, i32, i32, i32
  }
}

</mosaic_0001>

<bundles_post_ra>
// kernel: tpu_custom_call.1
= control target key start
LH: loop header
LB: loop body
LE: loop exit
PB: predicated region body
PF: predicated region fallthrough
CT: control target
= control target key end

     0   :  { %s888_s0 = inlined_call_operand.vmem [shape: s32[16], index: 0, kind: input, shape index: {}]   ;;  %s889_s1 = inlined_call_operand.vmem [shape: bf16[16,7,16], index: 1, kind: input, shape index: {}]   ;;  %s890_s2 = inlined_call_operand.vmem [shape: bf16[16,7,16], index: 2, kind: input, shape index: {}]   ;;  %s891_s3 = inlined_call_operand.vmem [shape: bf16[2,4,16,16], index: 3, kind: input, shape index: {}]   ;;  %s892_s4 = inlined_call_operand.vmem [shape: f32[16,4,7,7], index: 4, kind: output, shape index: {}]  }
   0x1   :  { %s9_s17 = sshll.u32 %s888_s0, 4  ;;  %s10_s17 = int_to_ptr.vmem [resolvable:$true] %s9_s17 }
   0x2   :  { %s787_s18 = scalar_lea.vmem %s10_s17, 16  ;;  %p792_p1 = scmp.lt.s32.totalorder %s10_s17, %s10_s17 }
   0x3   :  { %p788_p0 = scmp.ne.s32.totalorder %s10_s17, %s787_s18  ;;  %p793_p2 = scmp.lt.s32.totalorder %s787_s18, %s787_s18 }
   0x5   :  { %p794_p3 = por %p793_p2, %p792_p1 }
   0x7   :  { %p795_p4 = pnand %p794_p3, %p788_p0 }
   0x9   :  { %798 = shalt.err (!%p795_p4)  }
   0xa   :  { %s809_s19 = smov [#allocation3]  }
   0xb   :  { %12 = dma.vmem_to_smem %s10_s17, 16, %s809_s19, [#allocation2] }
   0xc   :  { %803 = dma.done.wait [#allocation2], 16 }
   0xd   :  { %804 = vsyncadd [#allocation2], 4294967280 }
   0xe   :  { %14 = sfence }
   0xf   :  { %s840_s20 = smov 0  }
  0x10 LB: > { %s681_s0 = sadd.s32 4294967295, %s807_s20   ;;  %p685_p5 = scmp.ge.s32.totalorder %s807_s20, 1  ;;  %s807_s20 = sphi %s840_s20, %s20_s20  }
  0x11   : > { %p166_p6 = scmp.lt.s32.totalorder %s807_s20, 17 }
  0x13   : > { %p167_p7 = pnand %p685_p5, %p166_p6 }
  0x14   : > { %p199_p8 = scmp.lt.s32.totalorder (!%p167_p7), %s681_s0, 15  ;;  %s207_s21 = sld [smem:[#allocation3 + %s681_s0]] (!%p167_p7) }
  0x15   : > { %170 = sbr.rel (%p167_p7) target bundleno = 447 (0x1bf), region = 32 }
  0x1a   : > { %v810_v0 = vmov 0.0   ;;  %s894_s0 = smov (!%p199_p8, %s681_s0), 15  ;;  %vm811_vm0 = vmmov 0   ;;  %vm235_vm1 = vcmask 130048   ;;  %p208_p9 = scmp.lt.s32.totalorder %s207_s21, 1  ;;  %vm597_vm2 = vcmask 55296  }
  0x1b   : > { %724 = vmatprep.subr.bf16.mxu0 %v810_v0  ;;  %730 = vmatprep.subr.bf16.mxu1 %v810_v0  ;;  %s686_s22 = sshll.u32 %s894_s0, 2  ;;  %s707_s7 = sshll.u32 %s894_s0, 5 }
  0x1c   : > { %726 = vmatprep.mubr.msk.bf16.mxu0 %vm811_vm0, %v810_v0  ;;  %732 = vmatprep.mubr.msk.bf16.mxu1 %vm811_vm0, %v810_v0  ;;  %s206_s25 = scalar_lea.vmem %s890_s2, %s686_s22  ;;  %s896_s21 = smov (!%p208_p9, %s207_s21), 1 }
  0x1d   : > { %v228_v1 = vld [vmem:[%s206_s25] sm:$0xf]  ;;  %s706_s26 = sshll.u32 %s896_s21, 5  ;;  %s202_s6 = scalar_lea.vmem %s889_s1, %s686_s22 }
  0x1e   : > { %v240_v2 = vsel %vm235_vm1, %v228_v1, 0  ;;  %s212_s29 = scalar_lea.vmem %s891_s3, %s706_s26  ;;  %v229_v17 = vld [vmem:[%s202_s6] sm:$0xf]  ;;  %s218_s10 = scalar_lea.vmem %s892_s4, %s707_s7 }
  0x1f   : > { %725 = vmatpush3.bf16.xpose.msra.mxu0 %v240_v2  ;;  %731 = vmatpush3.bf16.xpose.msra.mxu1 %v240_v2  ;;  %v783_v3 = vld [vmem:[%s212_s29] sm:$0xff]   ;;  %v784_v4 = vld [vmem:[%s212_s29 + $0x8] sm:$0xff]   ;;  %v785_v5 = vld [vmem:[%s212_s29 + $0x10] sm:$0xff]  }
  0x20   : > { %736 = vmatprep.subr.bf16.mxu0 %v810_v0  ;;  %742 = vmatprep.subr.bf16.mxu1 %v810_v0  ;;  %v786_v6 = vld [vmem:[%s212_s29 + $0x18] sm:$0xff]  }
  0x26   : > { %727 = vmatmul.mubr.msk.bf16.vlgmr.msra.gmra.mxu0 %vm235_vm1, %v783_v3  ;;  %733 = vmatmul.mubr.msk.bf16.vlgmr.msra.gmra.mxu1 %vm235_vm1, %v784_v4 }
  0x27   : > { %737 = vmatpush3.bf16.xpose.msra.mxu0 %v240_v2  ;;  %743 = vmatpush3.bf16.xpose.msra.mxu1 %v240_v2 }
  0x28   : > { %738 = vmatprep.mubr.msk.bf16.mxu0 %vm811_vm0, %v810_v0  ;;  %744 = vmatprep.mubr.msk.bf16.mxu1 %vm811_vm0, %v810_v0 }
  0x29   : > { %748 = vmatprep.subr.bf16.mxu0 %v810_v0  ;;  %754 = vmatprep.subr.bf16.mxu1 %v810_v0 }
  0x2e   : > { %739 = vmatmul.mubr.msk.bf16.vlgmr.msra.gmra.mxu0 %vm235_vm1, %v785_v5  ;;  %745 = vmatmul.mubr.msk.bf16.vlgmr.msra.gmra.mxu1 %vm235_vm1, %v786_v6 }
  0x2f   : > { %750 = vmatprep.mubr.msk.bf16.mxu0 %vm811_vm0, %v810_v0  ;;  %756 = vmatprep.mubr.msk.bf16.mxu1 %vm811_vm0, %v810_v0 }
  0xe6   : > { %v276_v7 = vpop.f32.mrf.mxu0  ;;  %v325_v8 = vpop.f32.mrf.mxu1 }
  0xe8   : > { %v728_v9 = vpop.f32.mrf.mxu0  ;;  %v734_v10 = vpop.f32.mrf.mxu1 }
  0xea   : > { %v279_v11 = vpop.f32.mrf.mxu0  ;;  %v328_v12 = vpop.f32.mrf.mxu1 }
  0xeb   : > { %v430_v13 = vpack.c.bf16 %v279_v11, %v276_v7  ;;  %v431_v14 = vpack.c.bf16 %v328_v12, %v325_v8 }
  0xec   : > { %v729_v15 = vpop.f32.mrf.mxu0  ;;  %v735_v16 = vpop.f32.mrf.mxu1 }
  0xed   : > { %749 = vmatpush3.bf16.msra.mxu0 %v430_v13  ;;  %755 = vmatpush3.bf16.msra.mxu1 %v431_v14 }
  0xee   : > { %v374_v18 = vpop.f32.mrf.mxu0  ;;  %v423_v19 = vpop.f32.mrf.mxu1  ;;  %760 = vmatprep.subr.bf16.mxu0 %v810_v0  ;;  %766 = vmatprep.subr.bf16.mxu1 %v810_v0 }
  0xf0   : > { %v740_v20 = vpop.f32.mrf.mxu0  ;;  %v746_v21 = vpop.f32.mrf.mxu1  ;;  %751 = vmatmul.mubr.msk.bf16.vlgmr.msra.gmra.mxu0 %vm235_vm1, %v229_v17  ;;  %757 = vmatmul.mubr.msk.bf16.vlgmr.msra.gmra.mxu1 %vm235_vm1, %v229_v17 }
  0xf1   : > { %762 = vmatprep.mubr.msk.bf16.mxu0 %vm811_vm0, %v810_v0  ;;  %768 = vmatprep.mubr.msk.bf16.mxu1 %vm811_vm0, %v810_v0 }
  0xf2   : > { %v377_v22 = vpop.f32.mrf.mxu0  ;;  %v426_v23 = vpop.f32.mrf.mxu1 }
  0xf3   : > { %v432_v24 = vpack.c.bf16 %v377_v22, %v374_v18  ;;  %v433_v25 = vpack.c.bf16 %v426_v23, %v423_v19 }
  0xf4   : > { %v741_v26 = vpop.f32.mrf.mxu0  ;;  %v747_v27 = vpop.f32.mrf.mxu1 }
  0xf5   : > { %761 = vmatpush3.bf16.msra.mxu0 %v432_v24  ;;  %767 = vmatpush3.bf16.msra.mxu1 %v433_v25 }
  0xf8   : > { %763 = vmatmul.mubr.msk.bf16.vlgmr.msra.gmra.mxu0 %vm235_vm1, %v229_v17  ;;  %769 = vmatmul.mubr.msk.bf16.vlgmr.msra.gmra.mxu1 %vm235_vm1, %v229_v17 }
 0x1b0   : > { %v471_v28 = vpop.f32.mrf.mxu0  ;;  %v511_v29 = vpop.f32.mrf.mxu1 }
 0x1b1   : > { %598 = vst.msk [vmem:[%s218_s10] sm:$0x7f] %vm597_vm2, %v471_v28  ;;  %599 = vst.msk [vmem:[%s218_s10 + $0x8] sm:$0x7f] %vm597_vm2, %v511_v29 }
 0x1b2   : > { %v752_v30 = vpop.f32.mrf.mxu0  ;;  %v758_v31 = vpop.f32.mrf.mxu1 }
 0x1b4   : > { %v474_v32 = vpop.f32.mrf.mxu0  ;;  %v514_v33 = vpop.f32.mrf.mxu1 }
 0x1b6   : > { %v753_v34 = vpop.f32.mrf.mxu0  ;;  %v759_v35 = vpop.f32.mrf.mxu1 }
 0x1b8   : > { %v551_v36 = vpop.f32.mrf.mxu0  ;;  %v591_v37 = vpop.f32.mrf.mxu1 }
 0x1b9   : > { %600 = vst.msk [vmem:[%s218_s10 + $0x10] sm:$0x7f] %vm597_vm2, %v551_v36  ;;  %601 = vst.msk [vmem:[%s218_s10 + $0x18] sm:$0x7f] %vm597_vm2, %v591_v37 }
 0x1ba   : > { %v764_v38 = vpop.f32.mrf.mxu0  ;;  %v770_v39 = vpop.f32.mrf.mxu1 }
 0x1bc   : > { %v554_v40 = vpop.f32.mrf.mxu0  ;;  %v594_v41 = vpop.f32.mrf.mxu1 }
 0x1be   : > { %v765_v42 = vpop.f32.mrf.mxu0  ;;  %v771_v43 = vpop.f32.mrf.mxu1 }
 0x1bf PF: > { %s20_s20 = sadd.s32 1, %s807_s20  }
 0x1c0   : > { %p17_p10 = scmp.ge.s32.totalorder %s20_s20, 18  }
 0x1c2   :  { %19 = sbr.rel (!%p17_p10) target bundleno = 16 (0x10), region = 68 }

</bundles_post_ra>
